<compile_context>
chip_gen: v7x
topology: tpu7x:2x2x1
jax: 0.10.0
libtpu: 0.0.40
codegen_flags: <defaults>
</compile_context>

<pallas_src>
import jax
import jax.numpy as jnp
from jax.experimental import pallas as pl
from jax.experimental.pallas import tpu as pltpu

_LANES = 128
_DEFAULT_VMEM_CAPACITY = 64 * 1024 * 1024  # conservative: v7x per-TC physical VMEM


def _vmem_limits():
    """Return (scoped vmem_limit_bytes, per-input-block budget), chip-aware."""
    try:
        cap = int(pltpu.get_tpu_info().vmem_capacity_bytes)
    except Exception:
        cap = _DEFAULT_VMEM_CAPACITY
    # ~half of physical: ~32 MiB on v7x (64 MiB phys), ~64 MiB on v5e/v6e (128 MiB).
    vmem_limit = min(max(cap // 2, 16 * 1024 * 1024), cap, 64 * 1024 * 1024)
    # Worst-case VMEM = 2*input_block + 2*output_block <= 4*budget, so
    # budget = limit // 5 leaves ~20% headroom.  Blocks past ~4 MiB are already
    # at the HBM-bandwidth plateau, so cap at 8 MiB (mem-bound kernel: bigger
    # blocks / deeper buffering cannot buy more bandwidth).
    block_budget = min(8 * 1024 * 1024, vmem_limit // 5)
    return vmem_limit, block_budget


def _fuzzy_and_kernel(x_ref, o_ref):
    # x_ref: (1, ct, rt, 128) VMEM tile; o_ref: (1, rt, 128) VMEM tile, kept
    # resident across the innermost (channel) grid axis as a running-min acc.
    c = pl.program_id(2)
    # C is off the vreg -> pure VPU elementwise mins across ct (rt,128) slabs.
    partial = jnp.min(x_ref[...], axis=1)

    @pl.when(c == 0)
    def _():
        o_ref[...] = partial

    @pl.when(c != 0)
    def _():
        o_ref[...] = jnp.minimum(o_ref[...], partial)


def _choose_tiles(C, R, itemsize, block_budget, B):
    """Pick (channel tile ct, spatial row tile rt)."""
    # dtype-native sublane multiple: 8 (f32), 16 (bf16), 32 (int8/fp8).
    sub = max(8, 32 // itemsize)

    # Channel tile: largest divisor of C whose minimal (ct, sub, 128) slab fits
    # the budget.  ct == C (no channel tiling) for all small/medium C; choosing
    # a divisor guarantees no junk channels ever enter the min.
    ct_cap = min(C, max(1, block_budget // (sub * _LANES * itemsize)))
    ct = next(d for d in range(ct_cap, 0, -1) if C % d == 0)

    # Spatial row tile from the remaining budget, dtype-native multiple.
    rt = block_budget // (ct * _LANES * itemsize)
    rt = max(sub, (rt // sub) * sub)
    if rt >= R:
        rt = R  # full-extent block: no divisibility requirement, no padding
        # v7x has 2 TensorCores; make sure the "parallel" grid has >= 2 tiles.
        # No effect on v5e/v6e (1 TC).
        if B == 1 and R >= 2 * sub:
            half = ((pl.cdiv(R, 2) + sub - 1) // sub) * sub
            if half < R:
                rt = half
    return ct, rt


def _min_over_channels_pallas(x: jax.Array, *, block_budget_bytes=None) -> jax.Array:
    """Pallas path: min over dim=1 of (B, C, H, W) -> (B, H, W)."""
    B, C, H, W = x.shape
    N = H * W
    itemsize = x.dtype.itemsize

    vmem_limit, default_budget = _vmem_limits()
    block_budget = block_budget_bytes or default_budget

    # Rows of 128 lanes covering the flattened spatial axis.
    R = pl.cdiv(N, _LANES)
    N_pad = R * _LANES

    x_flat = x.reshape(B, C, N)
    if N_pad != N:
        # Pad only to the next lane multiple.  Pad values are never observed:
        # the min is elementwise per position across C, and padded positions
        # map to output columns >= N that the final [:, :N] slice discards, so
        # a plain zero pad works for every dtype (incl. bool).
        # TODO(synk): this pad is still one extra HBM copy pass; the public
        # dispatcher routes lane-unaligned shapes to jnp.min instead.
        x_flat = jnp.pad(x_flat, ((0, 0), (0, 0), (0, N_pad - N)))
    x4 = x_flat.reshape(B, C, R, _LANES)

    ct, rt = _choose_tiles(C, R, itemsize, block_budget, B)

    # Partial last spatial block (cdiv): OOB rows read junk and their writeback
    # is masked; junk only ever lands in discarded output rows.
    grid = (B, pl.cdiv(R, rt), C // ct)

    out = pl.pallas_call(
        _fuzzy_and_kernel,
        out_shape=jax.ShapeDtypeStruct((B, R, _LANES), x.dtype),
        grid_spec=pltpu.PrefetchScalarGridSpec(
            num_scalar_prefetch=0,
            grid=grid,
            in_specs=[
                # (1, ct, rt, 128): channels off the vreg; lanes 128-dense.
                pl.BlockSpec((1, ct, rt, _LANES), lambda b, s, c: (b, c, s, 0)),
            ],
            # Output block index is constant across c -> resident accumulator.
            out_specs=pl.BlockSpec((1, rt, _LANES), lambda b, s, c: (b, s, 0)),
        ),
        compiler_params=pltpu.CompilerParams(
            # batch/spatial independent (shardable across v7x's 2 TCs);
            # channel axis is the reduction -> innermost + "arbitrary".
            dimension_semantics=("parallel", "parallel", "arbitrary"),
            vmem_limit_bytes=vmem_limit,
        ),
    )(x4)

    return out.reshape(B, N_pad)[:, :N].reshape(B, H, W)


def fuzzy_and_rule_layer(x: jax.Array, *, min_pallas_bytes: int = 1 << 20) -> jax.Array:
    """min over dim=1 of a (B, C, H, W) array -> (B, H, W).

    Tiny inputs (launch/per-step overhead dominates) and lane-unaligned
    spatial sizes (the pad-to-128 would cost a full extra HBM pass) are routed
    to plain jnp.min -- XLA's fused reduce is already at roofline for those.
    """
    _, _, H, W = x.shape
    if x.size * x.dtype.itemsize < min_pallas_bytes or (H * W) % _LANES != 0:
        return jnp.min(x, axis=1)
    return _min_over_channels_pallas(x)


if __name__ == "__main__":
    key = jax.random.PRNGKey(0)
    k1, k2, k3, k4 = jax.random.split(key, 4)

    # Shape consistent with the module's forward: (B=2, C=4, H=16, W=16).
    x = jax.random.uniform(k1, (2, 4, 16, 16), dtype=jnp.float32)
    out = jax.block_until_ready(_min_over_channels_pallas(x))
    ref = jnp.min(x, axis=1)
    assert out.shape == (2, 16, 16), out.shape
    assert jnp.array_equal(out, ref), "mismatch vs reference min-reduction"

    # Lane-unaligned spatial size (H*W = 400): exercises the pad-to-128 path.
    x2 = jax.random.uniform(k2, (2, 4, 20, 20), dtype=jnp.float32)
    out2 = jax.block_until_ready(_min_over_channels_pallas(x2))
    assert out2.shape == (2, 20, 20), out2.shape
    assert jnp.array_equal(out2, jnp.min(x2, axis=1)), "mismatch on padded path"

    # Force channel tiling + a partial last spatial block with a tiny budget:
    # C=6 -> ct=2 (3 "arbitrary" steps), R=20 rows -> rt=8 (3 tiles, last partial).
    x3 = jax.random.uniform(k3, (1, 6, 20, 128), dtype=jnp.float32)
    out3 = jax.block_until_ready(
        _min_over_channels_pallas(x3, block_budget_bytes=2 * 8 * 128 * 4))
    assert out3.shape == (1, 20, 128), out3.shape
    assert jnp.array_equal(out3, jnp.min(x3, axis=1)), "mismatch on C-tiled path"

    # bf16 path (16-row native sublane multiple).
    x4 = jax.random.normal(k4, (2, 4, 32, 64), dtype=jnp.bfloat16)
    out4 = jax.block_until_ready(_min_over_channels_pallas(x4))
    assert jnp.array_equal(out4, jnp.min(x4, axis=1)), "mismatch on bf16 path"

    # Public dispatcher (tiny input -> plain jnp.min fast path).
    out5 = jax.block_until_ready(fuzzy_and_rule_layer(x))
    assert jnp.array_equal(out5, ref)

    print("KERNEL_OK")
</pallas_src>

<mosaic_0001>
module attributes {stable_mosaic.version = 11 : i64} {
  func.func @_fuzzy_and_kernel(%arg0: i32, %arg1: i32, %arg2: i32, %arg3: memref<1x4x2x128xf32, #tpu.memory_space<vmem>>, %arg4: memref<1x2x128xf32, #tpu.memory_space<vmem>>) attributes {dimension_semantics = [#tpu.dimension_semantics<parallel>, #tpu.dimension_semantics<parallel>, #tpu.dimension_semantics<arbitrary>], iteration_bounds = array<i64: 2, 1, 1>, scalar_prefetch = 0 : i64, scratch_operands = 0 : i64, tpu.core_type = #tpu.core_type<tc>, window_params = [{transform_indices = @transform_0, window_bounds = array<i64: 1, 4, 2, 128>}, {transform_indices = @transform_1, window_bounds = array<i64: 1, 2, 128>}]} {
    %c0 = arith.constant 0 : index
    %c0_0 = arith.constant 0 : index
    %c0_1 = arith.constant 0 : index
    %c0_2 = arith.constant 0 : index
    %0 = vector.load %arg3[%c0, %c0_0, %c0_1, %c0_2] : memref<1x4x2x128xf32, #tpu.memory_space<vmem>>, vector<1x4x2x128xf32>
    %cst = arith.constant dense<0x7F800000> : vector<1x2x128xf32>
    %1 = vector.multi_reduction <minimumf>, %0, %cst [1] : vector<1x4x2x128xf32> to vector<1x2x128xf32>
    %c0_i32 = arith.constant 0 : i32
    %2 = arith.cmpi eq, %arg2, %c0_i32 : i32
    %3 = arith.extui %2 : i1 to i32
    %c0_i32_3 = arith.constant 0 : i32
    %4 = arith.cmpi ne, %3, %c0_i32_3 : i32
    scf.if %4 {
      %c0_6 = arith.constant 0 : index
      %c0_7 = arith.constant 0 : index
      %c0_8 = arith.constant 0 : index
      %8 = vector.load %arg4[%c0_6, %c0_7, %c0_8] : memref<1x2x128xf32, #tpu.memory_space<vmem>>, vector<1x2x128xf32>
      tpu.vector_store %arg4[%c0_6, %c0_7, %c0_8], %1 {strides = array<i32>} : memref<1x2x128xf32, #tpu.memory_space<vmem>>, vector<1x2x128xf32>,
    } else {
    }
    %c0_i32_4 = arith.constant 0 : i32
    %5 = arith.cmpi ne, %arg2, %c0_i32_4 : i32
    %6 = arith.extui %5 : i1 to i32
    %c0_i32_5 = arith.constant 0 : i32
    %7 = arith.cmpi ne, %6, %c0_i32_5 : i32
    scf.if %7 {
      %c0_6 = arith.constant 0 : index
      %c0_7 = arith.constant 0 : index
      %c0_8 = arith.constant 0 : index
      %8 = vector.load %arg4[%c0_6, %c0_7, %c0_8] : memref<1x2x128xf32, #tpu.memory_space<vmem>>, vector<1x2x128xf32>
      %9 = arith.minimumf %8, %1 : vector<1x2x128xf32>
      %c0_9 = arith.constant 0 : index
      %c0_10 = arith.constant 0 : index
      %c0_11 = arith.constant 0 : index
      %10 = vector.load %arg4[%c0_9, %c0_10, %c0_11] : memref<1x2x128xf32, #tpu.memory_space<vmem>>, vector<1x2x128xf32>
      tpu.vector_store %arg4[%c0_9, %c0_10, %c0_11], %9 {strides = array<i32>} : memref<1x2x128xf32, #tpu.memory_space<vmem>>, vector<1x2x128xf32>,
    } else {
    }
    return
  }
  func.func @transform_0(%arg0: i32, %arg1: i32, %arg2: i32) -> (i32, i32, i32, i32) {
    %c0_i32 = arith.constant 0 : i32
    %c0_i32_0 = arith.constant 0 : i32
    return %arg0, %arg2, %arg1, %c0_i32 : i32, i32, i32, i32
  }
  func.func @transform_1(%arg0: i32, %arg1: i32, %arg2: i32) -> (i32, i32, i32) {
    %c0_i32 = arith.constant 0 : i32
    %c0_i32_0 = arith.constant 0 : i32
    return %arg0, %arg1, %c0_i32 : i32, i32, i32
  }
}

</mosaic_0001>

<bundles_post_ra>
// kernel: tpu_custom_call.1
= control target key start
LH: loop header
LB: loop body
LE: loop exit
PB: predicated region body
PF: predicated region fallthrough
CT: control target
= control target key end

     0   :  { %6 = vsyncpa [#allocation3], 0  ;;  %s670_s0 = inlined_call_operand.hbm [shape: f32[2,4,2,128], index: 0, kind: input, shape index: {}]   ;;  %s671_s1 = inlined_call_operand.hbm [shape: f32[2,2,128], index: 1, kind: output, shape index: {}]  }
   0x1   :  { %8 = vsyncpa [#allocation3 + $0x1], 0 }
   0x2   :  { %9 = vsyncpa [#allocation4], 0 }
   0x3   :  { %11 = vsyncpa [#allocation4 + $0x1], 0  ;;  %s496_s6 = smov 0   ;;  %s498_s7 = smov 0  }
   0x4   :  { %s500_s8 = smov 0   ;;  %s502_s9 = smov 0  }
   0x5   :  { %s504_s10 = smov 0   ;;  %s506_s11 = smov 0  }
   0x6 LB: > { %s289_s12 = sadd.s32 4294967295, %s480_s11   ;;  %s290_s13 = sadd.s32 4294967294, %s480_s11   ;;  %s480_s11 = sphi %s506_s11, %s17_s11   ;;  %s476_s10 = sphi %s504_s10, %s686_s10   ;;  %s472_s9 = sphi %s502_s9, %s685_s9   ;;  %s468_s8 = sphi %s500_s8, %s684_s8   ;;  %s464_s7 = sphi %s498_s7, %s683_s7   ;;  %s460_s6 = sphi %s496_s6, %s682_s6  }
   0x7   : > { %s36_s14 = sadd.s32 1, %s476_s10  ;;  %s47_s15 = sadd.s32 1, %s468_s8 }
   0x8   : > { %p38_p0 = scmp.ge.s32.totalorder %s36_s14, 2  ;;  %p54_p1 = scmp.ne.s32.totalorder %s468_s8, %s464_s7 }
   0x9   : > { %p55_p2 = scmp.eq.s32.totalorder %s480_s11, 0  ;;  %p60_p3 = scmp.ne.s32.totalorder %s464_s7, %s460_s6 }
   0xa   : > { %s688_s14 = smov (%p38_p0, %s36_s14), 0  ;;  %p61_p5 = scmp.eq.s32.totalorder %s289_s12, 0 }
   0xb   : > { %p537_p4 = por %p55_p2, %p54_p1  ;;  %s40_s17 = ssub.s32 %s476_s10, %s688_s14 }
   0xc   : > { %p86_p6 = scmp.eq.s32.totalorder %s289_s12, 1  ;;  %p45_p7 = scmp.eq.s32.totalorder %s40_s17, 0 }
   0xd   : > { %p543_p8 = por %p61_p5, %p60_p3  ;;  %p92_p10 = scmp.eq.s32.totalorder %s290_s13, 1 }
   0xe   : > { %p547_p9 = por %p86_p6, %p54_p1  ;;  %p316_p13 = scmp.lt.s32.totalorder %s480_s11, 2 }
   0xf   : > { %s552_s20 = scalar_select %p45_p7, %s468_s8, %s47_s15  }
  0x10   : > { %s675_s19 = scalar_select %p547_p9, 1, 0 }
  0x11   : > { %p554_p11 = por %p92_p10, %p60_p3  ;;  %s112_s22 = sand.u32 1, %s468_s8  }
  0x12   : > { %s293_s23 = sshll.u32 %s112_s22, 3  ;;  %s303_s24 = sshll.u32 %s476_s10, 7 }
  0x13   : > { %s676_s21 = scalar_select %p554_p11, 1, 0 }
  0x14   : > { %s565_s27 = scalar_lea.hbm %s670_s0, %s303_s24  ;;  %s116_s28 = scalar_lea.vmem [#allocation2], %s293_s23 }
  0x15   : > { %s126_s29 = sshll.u32 %s116_s28, 4  ;;  %p571_p0 = pnand %p316_p13, %p537_p4  ;;  %s567_s29 = int_to_ptr.vmem [resolvable:$true] %s126_s29 }
  0x16   : > { %s576_s2 = scalar_lea.sflag [#allocation3], %s112_s22  ;;  %s368_s3 = scalar_lea.hbm %s565_s27, 128 }
  0x17   : > { %p369_p2 = scmp.ne.s32.totalorder %s565_s27, %s368_s3  ;;  %p370_p3 = pneg %p571_p0 }
  0x18   : > { %s373_s12 = scalar_lea.hbm %s670_s0, 256  ;;  %p374_p4 = scmp.lt.u32.totalorder %s565_s27, %s670_s0 }
  0x19   : > { %p371_p5 = pnand %p370_p3, %p369_p2  ;;  %p375_p7 = scmp.lt.u32.totalorder %s373_s12, %s368_s3 }
  0x1a   : > { %p377_p13 = scmp.lt.u32.totalorder %s368_s3, %s565_s27 }
  0x1b   : > { %p372_p6 = pneg %p371_p5  ;;  %p376_p10 = por %p375_p7, %p374_p4 }
  0x1d   : > { %p378_p12 = por %p377_p13, %p376_p10 }
  0x1f   : > { %p379_p1 = pnand %p378_p12, %p372_p6 }
  0x21   : > { %382 = shalt.err (!%p379_p1)
}
  0x22   : > { %s383_s16 = scalar_lea.vmem %s567_s29, 128  ;;  %s482_s17 = smov [#allocation2]  }
  0x23   : > { %p384_p2 = scmp.ne.s32.totalorder %s567_s29, %s383_s16  ;;  %s388_s22 = sshll.u32 %s482_s17, 4  ;;  %s389_s22 = int_to_ptr.vmem [resolvable:$false] %s388_s22 }
  0x24   : > { %s390_s23 = scalar_lea.vmem %s389_s22, 256  ;;  %p391_p9 = scmp.lt.s32.totalorder %s567_s29, %s389_s22 }
  0x25   : > { %p386_p5 = pnand %p384_p2, %p370_p3  ;;  %p392_p4 = scmp.lt.s32.totalorder %s390_s23, %s383_s16 }
  0x27   : > { %p387_p11 = pneg %p386_p5  ;;  %p393_p7 = por %p392_p4, %p391_p9 }
  0x29   : > { %p394_p10 = pnand %p393_p7, %p387_p11 }
  0x2b   : > { %397 = shalt.err (!%p394_p10)
}
  0x2c   : > { %s483_s24 = smov 32   ;;  %s484_s25 = smov 2  }
  0x2d   : > { %311 = dma.hbm_to_vmem [thread:$0]  (!%p571_p0), %s565_s27, 128, %s567_s29, %s576_s2, %s483_s24, %s483_s24, %s484_s25  }
  0x2e   : > { %p134_p12 = scmp.lt.s32.totalorder %s480_s11, 3  ;;  %p678_p1 = scmp.ge.s32.totalorder %s480_s11, 1 }
  0x30   : > { %p135_p3 = pnand %p678_p1, %p134_p12 }
  0x31   : > { %s608_s26 = sand.u32 (!%p135_p3), 1, %s464_s7  }
  0x32   : > { %138 = sbr.rel (%p135_p3) target bundleno = 84 (0x54), region = 24  ;;  %s297_s28 = sshll.u32 (!%p135_p3), %s608_s26, 3 }
  0x33   : > { %s141_s3 = scalar_lea.sflag (!%p135_p3), [#allocation3], %s608_s26  ;;  %s144_s4 = scalar_lea.vmem (!%p135_p3), [#allocation2], %s297_s28 }
  0x39   : > { %451 = dma.done.wait (%p543_p8), %s141_s3, 128  }
  0x3a   : > { %453 = vsyncadd (%p543_p8), %s141_s3, 4294967168  ;;  %s298_s27 = sshll.u32 %s608_s26, 1  ;;  %vm168_vm0 = vcmask 1041408   ;;  %v164_v0 = vld [vmem:[%s144_s4] sm:$0x3]  ;;  %s300_s2 = sshll.u32 %s472_s9, 5 }
  0x3b   : > { %v165_v1 = vld [vmem:[%s144_s4 + $0x2] sm:$0x3]  ;;  %v166_v2 = vld [vmem:[%s144_s4 + $0x4] sm:$0x3]  ;;  %v167_v3 = vld [vmem:[%s144_s4 + $0x6] sm:$0x3]  ;;  %s623_s12 = scalar_lea.hbm %s671_s1, %s300_s2 }
  0x3c   : > { %v169_v4 = vsel %vm168_vm0, %v164_v0, inf  ;;  %v170_v5 = vsel %vm168_vm0, %v165_v1, inf  ;;  %v171_v6 = vsel %vm168_vm0, %v166_v2, inf  ;;  %v172_v7 = vsel %vm168_vm0, %v167_v3, inf  ;;  %s162_s29 = scalar_lea.vmem [#allocation5], %s298_s27  ;;  %s189_s13 = scalar_lea.sflag [#allocation4], %s608_s26 }
  0x3d   : > { %v173_v8 = vmin.f32 %v169_v4, %v170_v5  ;;  %s203_s30 = sshll.u32 %s162_s29, 4  ;;  %v174_v9 = vmin.f32 %v171_v6, %v172_v7  ;;  %p679_p9 = scmp.ne.s32.totalorder %s675_s19, 0  ;;  %s618_s30 = int_to_ptr.vmem [resolvable:$true] %s203_s30 }
  0x3e   : > { %s398_s15 = scalar_lea.vmem %s618_s30, 32  ;;  %s485_s9 = smov [#allocation5]  }
  0x3f   : > { %v175_v10 = vmin.f32 %v173_v8, %v174_v9  ;;  %p399_p8 = scmp.ne.s32.totalorder %s618_s30, %s398_s15  ;;  %s402_s16 = sshll.u32 %s485_s9, 4  ;;  %s403_s16 = int_to_ptr.vmem [resolvable:$false] %s402_s16 }
  0x40   : > { %s404_s17 = scalar_lea.vmem %s403_s16, 64  ;;  %p405_p6 = scmp.lt.s32.totalorder %s618_s30, %s403_s16 }
  0x41   : > { %180 = vst [vmem:[%s162_s29] sm:$0x3] %v175_v10  ;;  %p400_p11 = pnand %p399_p8, %p679_p9  ;;  %p406_p13 = scmp.lt.s32.totalorder %s404_s17, %s398_s15 }
  0x43   : > { %p401_p0 = pneg %p400_p11  ;;  %p407_p2 = por %p406_p13, %p405_p6 }
  0x45   : > { %p408_p5 = pnand %p407_p2, %p401_p0 }
  0x47   : > { %411 = shalt.err (!%p408_p5)
}
  0x48   : > { %s412_s22 = scalar_lea.hbm %s623_s12, 32  ;;  %s416_s25 = scalar_lea.hbm %s671_s1, 64 }
  0x49   : > { %p413_p4 = scmp.ne.s32.totalorder %s623_s12, %s412_s22  ;;  %p417_p12 = scmp.lt.u32.totalorder %s623_s12, %s671_s1 }
  0x4a   : > { %p418_p1 = scmp.lt.u32.totalorder %s416_s25, %s412_s22  ;;  %p420_p8 = scmp.lt.u32.totalorder %s412_s22, %s623_s12 }
  0x4b   : > { %p414_p7 = pnand %p413_p4, %p679_p9 }
  0x4c   : > { %p419_p3 = por %p418_p1, %p417_p12 }
  0x4d   : > { %p415_p10 = pneg %p414_p7 }
  0x4e   : > { %p421_p11 = por %p420_p8, %p419_p3 }
  0x50   : > { %p422_p0 = pnand %p421_p11, %p415_p10 }
  0x52   : > { %425 = shalt.err (!%p422_p0)
}
  0x53   : > { %306 = dma.vmem_to_hbm [thread:$0]  (%p679_p9), %s618_s30, 32, %s623_s12, %s189_s13  }
  0x54 PF: > { %s215_s3 = sand.u32 1, %s460_s6   ;;  %p680_p6 = scmp.ne.s32.totalorder %s676_s21, 0 }
  0x55   : > { %p681_p13 = scmp.ge.s32.totalorder %s480_s11, 2  ;;  %s216_s4 = scalar_lea.sflag [#allocation4], %s215_s3 }
  0x57   : > { %p313_p2 = pnand %p681_p13, %p680_p6 }
  0x59   : > { %455 = dma.done.wait (!%p313_p2), %s216_s4, 32  }
  0x5a   : > { %457 = vsyncadd (!%p313_p2), %s216_s4, 4294967264  ;;  %s17_s11 = sadd.s32 1, %s480_s11   ;;  %s682_s6 = smov %s464_s7 }
  0x5b   : > { %p14_p5 = scmp.ge.s32.totalorder %s17_s11, 4   ;;  %s683_s7 = smov %s468_s8 }
  0x5c   : > { %s684_s8 = smov %s552_s20  ;;  %s685_s9 = smov %s476_s10 }
  0x5d   : > { %s686_s10 = smov %s688_s14  ;;  %16 = sbr.rel (!%p14_p5) target bundleno = 6 (0x6), region = 77 }
  0x64   :  { %221 = vsyncpa [#allocation3], 1 }
  0x65   :  { %223 = vsyncpa [#allocation3 + $0x1], 1 }
  0x66   :  { %224 = vsyncpa [#allocation4], 1 }
  0x67   :  { %226 = vsyncpa [#allocation4 + $0x1], 1 }

</bundles_post_ra>
